<compile_context>
chip_gen: v6e
topology: v6e:2x2x1
jax: 0.10.0
libtpu: 0.0.40
codegen_flags: <defaults>
</compile_context>

<pallas_src>
import jax
import jax.numpy as jnp
from jax.experimental import pallas as pl
from jax.experimental.pallas import tpu as pltpu


def _round_up(x, m):
    return (x + m - 1) // m * m


def _gated_pooling_kernel(x_ref, batch_ref, wg_ref, bg_ref, wp_ref, bp_ref,
                          out_ref, acc_ref):
    # x_ref:     (TILE_N, D)    node features (bf16 or f32)  [pipelined over N]
    # batch_ref: (1, TILE_N)    int32 graph id per node      [pipelined over N]
    # wg_ref:    (1, D)         f32 gate weight row
    # bg_ref:    (1, 1)         f32 gate bias (SMEM)
    # wp_ref:    (D, P_pad)     f32 pooling weight (transposed, lane-padded)
    # bp_ref:    (1, P_pad)     f32 pooling bias
    # out_ref:   (B_pad, P_pad) f32 output (resident across the whole grid)
    # acc_ref:   (B_pad, D)     f32 VMEM scratch pool accumulator
    i = pl.program_id(0)

    @pl.when(i == 0)
    def _init():
        acc_ref[...] = jnp.zeros_like(acc_ref)

    x = x_ref[...]
    x_f32 = x.astype(jnp.float32)

    # Gate: alpha = x @ wg^T + bg, as VPU multiply + XLU lane reduction (f32).
    alpha = jnp.sum(x_f32 * wg_ref[...], axis=-1, keepdims=True) + bg_ref[0, 0]

    # Gated features, cast to the streaming dtype for the bf16 MXU path.
    gated = (alpha * x_f32).astype(x.dtype)                       # (TILE_N, D)

    # Scatter-sum over graph ids as a one-hot matmul on the MXU; f32 accumulation.
    b_pad = acc_ref.shape[0]
    tile_n = x.shape[0]
    iota_b = jax.lax.broadcasted_iota(jnp.int32, (b_pad, tile_n), 0)
    onehot = (iota_b == batch_ref[...]).astype(x.dtype)           # (B_pad, TILE_N)
    acc_ref[...] += jnp.dot(onehot, gated, preferred_element_type=jnp.float32)

    @pl.when(i == pl.num_programs(0) - 1)
    def _finalize():
        out = jnp.dot(acc_ref[...], wp_ref[...],
                      preferred_element_type=jnp.float32) + bp_ref[...]
        out_ref[...] = out.astype(out_ref.dtype)


def gated_pooling(node_features, batch_list, wg, bg, wp, bp, num_graphs,
                  *, tile_n=1024):
    """node_features: (N, D); batch_list: (N,) int; returns (num_graphs, P) f32."""
    N, D = node_features.shape
    P = wp.shape[0]
    x_dtype = node_features.dtype
    xb = jnp.dtype(x_dtype).itemsize

    # ---- tiled / padded geometry -------------------------------------------
    if N <= tile_n:
        TILE_N = _round_up(max(N, 8), 8)     # single tile covering the whole array
    else:
        assert tile_n % 128 == 0, "tile_n must be a multiple of 128 when N > tile_n"
        TILE_N = tile_n
    N_pad = _round_up(N, TILE_N)
    B_pad = _round_up(max(num_graphs, 8), 8)    # sublane-dense accumulator/output rows
    P_pad = _round_up(max(P, 128), 128)         # lane-dense projection/output

    # ---- host-side padding / layout ----------------------------------------
    x = node_features
    batch = batch_list.astype(jnp.int32)
    if N_pad != N:
        x = jnp.pad(x, ((0, N_pad - N), (0, 0)))
        # Pad id = B_pad never matches any one-hot row -> padded nodes contribute 0.
        batch = jnp.pad(batch, (0, N_pad - N), constant_values=B_pad)
    batch_row = batch.reshape(1, N_pad)

    wg_row = wg.reshape(1, D).astype(jnp.float32)
    bg_s = bg.reshape(1, 1).astype(jnp.float32)
    wp_t = jnp.zeros((D, P_pad), jnp.float32).at[:, :P].set(wp.T.astype(jnp.float32))
    bp_r = jnp.zeros((1, P_pad), jnp.float32).at[:, :P].set(
        bp.reshape(1, P).astype(jnp.float32))

    grid = (N_pad // TILE_N,)

    # ---- VMEM budget (double-buffered slabs + scratch + headroom) -----------
    d_pad = max(D, 128)
    vmem_est = (2 * TILE_N * D * xb                 # x double buffer
                + 2 * 8 * TILE_N * 4                # batch row (sublane-padded)
                + B_pad * d_pad * 4                 # pool accumulator
                + D * P_pad * 4 + 8 * P_pad * 4 + 8 * d_pad * 4  # weights / biases
                + 2 * B_pad * P_pad * 4             # output block
                + 6 * TILE_N * d_pad * 4)           # in-kernel temporaries headroom
    vmem_limit = int(min(max(2 * vmem_est, 16 * 1024 * 1024), 64 * 1024 * 1024))

    cost = pl.CostEstimate(
        flops=int(3 * N_pad * D + 2 * B_pad * N_pad * D + 2 * B_pad * D * P_pad),
        transcendentals=0,
        bytes_accessed=int(N_pad * D * xb + N_pad * 4 + D * P_pad * 4
                           + P_pad * 4 + D * 4 + B_pad * P_pad * 4),
    )

    out_pad = pl.pallas_call(
        _gated_pooling_kernel,
        out_shape=jax.ShapeDtypeStruct((B_pad, P_pad), jnp.float32),
        grid=grid,
        in_specs=[
            pl.BlockSpec((TILE_N, D), lambda i: (i, 0)),            # x slab
            pl.BlockSpec((1, TILE_N), lambda i: (0, i)),            # batch ids row
            pl.BlockSpec((1, D), lambda i: (0, 0)),                 # gate weight
            pl.BlockSpec(memory_space=pltpu.MemorySpace.SMEM),      # gate bias scalar
            pl.BlockSpec((D, P_pad), lambda i: (0, 0)),             # pooling weight^T
            pl.BlockSpec((1, P_pad), lambda i: (0, 0)),             # pooling bias
        ],
        out_specs=pl.BlockSpec((B_pad, P_pad), lambda i: (0, 0)),
        scratch_shapes=[pltpu.VMEM((B_pad, D), jnp.float32)],
        compiler_params=pltpu.CompilerParams(
            dimension_semantics=("arbitrary",),
            vmem_limit_bytes=vmem_limit,
        ),
        cost_estimate=cost,
    )(x, batch_row, wg_row, bg_s, wp_t, bp_r)

    return out_pad[:num_graphs, :P]


def _reference(node_features, batch_list, wg, bg, wp, bp, num_graphs):
    hi = jax.lax.Precision.HIGHEST
    alpha = jnp.dot(node_features, wg.T, precision=hi) + bg         # (N, 1)
    gated = alpha * node_features                                   # (N, D)
    pool = jax.ops.segment_sum(gated, batch_list, num_segments=num_graphs)
    return jnp.dot(pool, wp.T, precision=hi) + bp                   # (B, P)


def _run_case(key, N, D, P, B, tile_n):
    k_x, k_b, k_wg, k_bg, k_wp, k_bp = jax.random.split(key, 6)

    node_features_f32 = jax.random.normal(k_x, (N, D), dtype=jnp.float32)
    # Stream node features as bf16 (halves HBM bytes; bf16 MXU path); math stays f32.
    node_features = node_features_f32.astype(jnp.bfloat16)
    batch_list = jax.random.randint(k_b, (N,), 0, B, dtype=jnp.int32)

    # nn.Linear-shaped params: (out, in) weights + (out,) biases.
    wg = jax.random.normal(k_wg, (1, D), dtype=jnp.float32) * 0.1   # hgate_node
    bg = jax.random.normal(k_bg, (1,), dtype=jnp.float32) * 0.1
    wp = jax.random.normal(k_wp, (P, D), dtype=jnp.float32) * 0.1   # poolingLayer
    bp = jax.random.normal(k_bp, (P,), dtype=jnp.float32) * 0.1

    out = gated_pooling(node_features, batch_list, wg, bg, wp, bp,
                        num_graphs=B, tile_n=tile_n)
    out = jax.block_until_ready(out)

    ref = _reference(node_features.astype(jnp.float32), batch_list, wg, bg, wp, bp, B)
    assert out.shape == (B, P)
    assert jnp.allclose(out, ref, atol=8e-2, rtol=8e-2), "mismatch vs reference"


if __name__ == "__main__":
    key = jax.random.PRNGKey(0)
    k1, k2 = jax.random.split(key, 2)

    # Small single-tile case: 16 nodes, node_dim=32, pooling_dim=32, 2 graphs.
    _run_case(k1, N=16, D=32, P=32, B=2, tile_n=1024)

    # Multi-tile case exercising the pipelined N-axis reduction and padding
    # (3 grid steps of 128 nodes, P=48 padded to 128, B=3 padded to 8).
    _run_case(k2, N=384, D=32, P=48, B=3, tile_n=128)

    print("KERNEL_OK")
</pallas_src>

<mosaic_0001>
module attributes {stable_mosaic.version = 11 : i64} {
  func.func @_gated_pooling_kernel(%arg0: i32, %arg1: memref<16x32xbf16, #tpu.memory_space<vmem>>, %arg2: memref<1x16xi32, #tpu.memory_space<vmem>>, %arg3: memref<1x32xf32, #tpu.memory_space<vmem>>, %arg4: memref<1x1xf32, #tpu.memory_space<smem>>, %arg5: memref<32x128xf32, #tpu.memory_space<vmem>>, %arg6: memref<1x128xf32, #tpu.memory_space<vmem>>, %arg7: memref<8x128xf32, #tpu.memory_space<vmem>>, %arg8: memref<8x32xf32, #tpu.memory_space<vmem>>) attributes {dimension_semantics = [#tpu.dimension_semantics<arbitrary>], iteration_bounds = array<i64: 1>, scalar_prefetch = 0 : i64, scratch_operands = 1 : i64, tpu.core_type = #tpu.core_type<tc>, window_params = [{transform_indices = @transform_0, window_bounds = array<i64: 16, 32>}, {transform_indices = @transform_1, window_bounds = array<i64: 1, 16>}, {pipeline_mode = #tpu.pipeline_mode<synchronous>, transform_indices = @transform_2, window_bounds = array<i64: 1, 32>}, {transform_indices = @transform_3, window_bounds = array<i64: 1, 1>}, {pipeline_mode = #tpu.pipeline_mode<synchronous>, transform_indices = @transform_4, window_bounds = array<i64: 32, 128>}, {pipeline_mode = #tpu.pipeline_mode<synchronous>, transform_indices = @transform_5, window_bounds = array<i64: 1, 128>}, {pipeline_mode = #tpu.pipeline_mode<synchronous>, transform_indices = @transform_6, window_bounds = array<i64: 8, 128>}]} {
    %c0_i32 = arith.constant 0 : i32
    %0 = arith.cmpi eq, %arg0, %c0_i32 : i32
    %1 = arith.extui %0 : i1 to i32
    %c0_i32_0 = arith.constant 0 : i32
    %2 = arith.cmpi ne, %1, %c0_i32_0 : i32
    scf.if %2 {
      %cst_15 = arith.constant 0.000000e+00 : f32
      %30 = vector.broadcast %cst_15 : f32 to vector<8x32xf32>
      %c0_16 = arith.constant 0 : index
      %c0_17 = arith.constant 0 : index
      %31 = vector.load %arg8[%c0_16, %c0_17] : memref<8x32xf32, #tpu.memory_space<vmem>>, vector<8x32xf32>
      tpu.vector_store %arg8[%c0_16, %c0_17], %30 {strides = array<i32>} : memref<8x32xf32, #tpu.memory_space<vmem>>, vector<8x32xf32>,
    } else {
    }
    %c0 = arith.constant 0 : index
    %c0_1 = arith.constant 0 : index
    %3 = vector.load %arg1[%c0, %c0_1] : memref<16x32xbf16, #tpu.memory_space<vmem>>, vector<16x32xbf16>
    %4 = arith.extf %3 : vector<16x32xbf16> to vector<16x32xf32>
    %c0_2 = arith.constant 0 : index
    %c0_3 = arith.constant 0 : index
    %5 = vector.load %arg3[%c0_2, %c0_3] : memref<1x32xf32, #tpu.memory_space<vmem>>, vector<1x32xf32>
    %6 = vector.broadcast %5 : vector<1x32xf32> to vector<16x32xf32>
    %7 = arith.mulf %4, %6 : vector<16x32xf32>
    %cst = arith.constant dense<0.000000e+00> : vector<16xf32>
    %8 = vector.multi_reduction <add>, %7, %cst [1] : vector<16x32xf32> to vector<16xf32>
    %9 = vector.shape_cast %8 : vector<16xf32> to vector<16x1xf32>
    %c0_4 = arith.constant 0 : index
    %c0_5 = arith.constant 0 : index
    %10 = memref.load %arg4[%c0_4, %c0_5] : memref<1x1xf32, #tpu.memory_space<smem>>
    %11 = vector.broadcast %10 : f32 to vector<16x1xf32>
    %12 = arith.addf %9, %11 : vector<16x1xf32>
    %13 = vector.broadcast %12 : vector<16x1xf32> to vector<16x32xf32>
    %14 = arith.mulf %13, %4 : vector<16x32xf32>
    %15 = arith.truncf %14 : vector<16x32xf32> to vector<16x32xbf16>
    %16 = tpu.iota {dimensions = array<i32: 0>} : vector<8x16xi32>
    %c0_6 = arith.constant 0 : index
    %c0_7 = arith.constant 0 : index
    %17 = vector.load %arg2[%c0_6, %c0_7] : memref<1x16xi32, #tpu.memory_space<vmem>>, vector<1x16xi32>
    %18 = vector.broadcast %17 : vector<1x16xi32> to vector<8x16xi32>
    %19 = arith.cmpi eq, %16, %18 : vector<8x16xi32>
    %20 = arith.extui %19 : vector<8x16xi1> to vector<8x16xi32>
    %21 = arith.sitofp %20 : vector<8x16xi32> to vector<8x16xf32>
    %22 = arith.truncf %21 : vector<8x16xf32> to vector<8x16xbf16>
    %c0_8 = arith.constant 0 : index
    %c0_9 = arith.constant 0 : index
    %23 = vector.load %arg8[%c0_8, %c0_9] : memref<8x32xf32, #tpu.memory_space<vmem>>, vector<8x32xf32>
    %cst_10 = arith.constant dense<0.000000e+00> : vector<8x32xf32>
    %24 = tpu.matmul %22, %15, %cst_10 {dimension_numbers = #tpu.dot_dimension_numbers<[1], [0], [0], [1], [0, 0, 1, 1], [], []>} : vector<8x16xbf16>, vector<16x32xbf16>, vector<8x32xf32> -> vector<8x32xf32>
    %25 = arith.addf %23, %24 : vector<8x32xf32>
    %c0_11 = arith.constant 0 : index
    %c0_12 = arith.constant 0 : index
    %26 = vector.load %arg8[%c0_11, %c0_12] : memref<8x32xf32, #tpu.memory_space<vmem>>, vector<8x32xf32>
    tpu.vector_store %arg8[%c0_11, %c0_12], %25 {strides = array<i32>} : memref<8x32xf32, #tpu.memory_space<vmem>>, vector<8x32xf32>,
    %c0_i32_13 = arith.constant 0 : i32
    %27 = arith.cmpi eq, %arg0, %c0_i32_13 : i32
    %28 = arith.extui %27 : i1 to i32
    %c0_i32_14 = arith.constant 0 : i32
    %29 = arith.cmpi ne, %28, %c0_i32_14 : i32
    scf.if %29 {
      %c0_15 = arith.constant 0 : index
      %c0_16 = arith.constant 0 : index
      %30 = vector.load %arg8[%c0_15, %c0_16] : memref<8x32xf32, #tpu.memory_space<vmem>>, vector<8x32xf32>
      %c0_17 = arith.constant 0 : index
      %c0_18 = arith.constant 0 : index
      %31 = vector.load %arg5[%c0_17, %c0_18] : memref<32x128xf32, #tpu.memory_space<vmem>>, vector<32x128xf32>
      %cst_19 = arith.constant dense<0.000000e+00> : vector<8x128xf32>
      %32 = tpu.matmul %30, %31, %cst_19 {dimension_numbers = #tpu.dot_dimension_numbers<[1], [0], [0], [1], [0, 0, 1, 1], [], []>} : vector<8x32xf32>, vector<32x128xf32>, vector<8x128xf32> -> vector<8x128xf32>
      %c0_20 = arith.constant 0 : index
      %c0_21 = arith.constant 0 : index
      %33 = vector.load %arg6[%c0_20, %c0_21] : memref<1x128xf32, #tpu.memory_space<vmem>>, vector<1x128xf32>
      %34 = vector.broadcast %33 : vector<1x128xf32> to vector<8x128xf32>
      %35 = arith.addf %32, %34 : vector<8x128xf32>
      %c0_22 = arith.constant 0 : index
      %c0_23 = arith.constant 0 : index
      %36 = vector.load %arg7[%c0_22, %c0_23] : memref<8x128xf32, #tpu.memory_space<vmem>>, vector<8x128xf32>
      tpu.vector_store %arg7[%c0_22, %c0_23], %35 {strides = array<i32>} : memref<8x128xf32, #tpu.memory_space<vmem>>, vector<8x128xf32>,
    } else {
    }
    return
  }
  func.func @transform_0(%arg0: i32) -> (i32, i32) {
    %c0_i32 = arith.constant 0 : i32
    %c0_i32_0 = arith.constant 0 : i32
    return %arg0, %c0_i32 : i32, i32
  }
  func.func @transform_1(%arg0: i32) -> (i32, i32) {
    %c0_i32 = arith.constant 0 : i32
    %c0_i32_0 = arith.constant 0 : i32
    return %c0_i32, %arg0 : i32, i32
  }
  func.func @transform_2(%arg0: i32) -> (i32, i32) {
    %c0_i32 = arith.constant 0 : i32
    %c0_i32_0 = arith.constant 0 : i32
    %c0_i32_1 = arith.constant 0 : i32
    return %c0_i32, %c0_i32_0 : i32, i32
  }
  func.func @transform_3(%arg0: i32) -> (i32, i32) {
    %c0_i32 = arith.constant 0 : i32
    %c0_i32_0 = arith.constant 0 : i32
    %c0_i32_1 = arith.constant 0 : i32
    return %c0_i32, %c0_i32_0 : i32, i32
  }
  func.func @transform_4(%arg0: i32) -> (i32, i32) {
    %c0_i32 = arith.constant 0 : i32
    %c0_i32_0 = arith.constant 0 : i32
    %c0_i32_1 = arith.constant 0 : i32
    return %c0_i32, %c0_i32_0 : i32, i32
  }
  func.func @transform_5(%arg0: i32) -> (i32, i32) {
    %c0_i32 = arith.constant 0 : i32
    %c0_i32_0 = arith.constant 0 : i32
    %c0_i32_1 = arith.constant 0 : i32
    return %c0_i32, %c0_i32_0 : i32, i32
  }
  func.func @transform_6(%arg0: i32) -> (i32, i32) {
    %c0_i32 = arith.constant 0 : i32
    %c0_i32_0 = arith.constant 0 : i32
    %c0_i32_1 = arith.constant 0 : i32
    return %c0_i32, %c0_i32_0 : i32, i32
  }
}

</mosaic_0001>

<bundles_post_ra>
// kernel: tpu_custom_call.1
= control target key start
LH: loop header
LB: loop body
LE: loop exit
PB: predicated region body
PF: predicated region fallthrough
CT: control target
= control target key end

     0   :  { %12 = vsyncpa [#allocation5], 0  ;;  %s429_s0 = inlined_call_operand.hbm [shape: bf16[16,32], index: 0, kind: input, shape index: {}]   ;;  %s430_s1 = inlined_call_operand.vmem [shape: s32[1,16], index: 1, kind: input, shape index: {}]   ;;  %s431_s2 = inlined_call_operand.vmem [shape: f32[1,32], index: 2, kind: input, shape index: {}]   ;;  %s432_s3 = inlined_call_operand.<no memory space> [shape: f32[1,1], index: 3, kind: input, shape index: {}]   ;;  %s433_s4 = inlined_call_operand.hbm [shape: f32[32,128], index: 4, kind: input, shape index: {}]   ;;  %s434_s5 = inlined_call_operand.vmem [shape: f32[1,128], index: 5, kind: input, shape index: {}]   ;;  %s435_s6 = inlined_call_operand.hbm [shape: f32[8,128], index: 6, kind: output, shape index: {}]  }
   0x1   :  { %13 = vsyncpa [#allocation8], 0 }
   0x2   :  { %14 = vsyncpa [#allocation6], 0  ;;  %s359_s21 = smov [#allocation4]  }
   0x3   :  { %s20_s22 = sshll.u32 %s359_s21, 4  ;;  %s21_s22 = int_to_ptr.vmem [resolvable:$true] %s20_s22 }
   0x4   :  { %s301_s23 = scalar_lea.vmem %s21_s22, 128  ;;  %p306_p1 = scmp.lt.s32.totalorder %s21_s22, %s21_s22 }
   0x5   :  { %p302_p0 = scmp.ne.s32.totalorder %s21_s22, %s301_s23  ;;  %p307_p2 = scmp.lt.s32.totalorder %s301_s23, %s301_s23 }
   0x7   :  { %p308_p3 = por %p307_p2, %p306_p1 }
   0x9   :  { %p309_p4 = pnand %p308_p3, %p302_p0 }
   0xb   :  { %312 = shalt.err (!%p309_p4)
}
   0xc   :  { %s360_s24 = smov 64   ;;  %s361_s25 = smov 4  }
   0xd   :  { %26 = dma.hbm_to_vmem [thread:$0]  %s429_s0, 128, %s21_s22, [#allocation5], %s360_s24, %s360_s24, %s361_s25  }
   0xe   :  { %s362_s28 = smov [#allocation7]  }
   0xf   :  { %s38_s29 = sshll.u32 %s362_s28, 4  ;;  %s39_s29 = int_to_ptr.vmem [resolvable:$true] %s38_s29 }
  0x10   :  { %s321_s30 = scalar_lea.vmem %s39_s29, 512  ;;  %p326_p6 = scmp.lt.s32.totalorder %s39_s29, %s39_s29 }
  0x11   :  { %p322_p5 = scmp.ne.s32.totalorder %s39_s29, %s321_s30  ;;  %p327_p7 = scmp.lt.s32.totalorder %s321_s30, %s321_s30 }
  0x13   :  { %p328_p8 = por %p327_p7, %p326_p6 }
  0x15   :  { %p329_p9 = pnand %p328_p8, %p322_p5 }
  0x17   :  { %332 = shalt.err (!%p329_p9)
}
  0x18   :  { %s363_s7 = smov 128   ;;  %s364_s8 = smov 8  }
  0x19   :  { %44 = dma.hbm_to_vmem [thread:$0]  %s433_s4, 512, %s39_s29, [#allocation8], %s363_s7, %s363_s7, %s364_s8  }
  0x1a   :  { %353 = dma.done.wait [#allocation5], 128  }
  0x1b   :  { %354 = vsyncadd [#allocation5], 4294967168 }
  0x1c   :  { %355 = dma.done.wait [#allocation8], 512  }
  0x1d   :  { %356 = vsyncadd [#allocation8], 4294966784  ;;  %vm58_vm0 = vcmask 261120   ;;  %v365_v0 = vmov 0.0   ;;  %v257_v1 = vld [vmem:[#allocation4] sm:$0xff]   ;;  %vm366_vm1 = vmmov 0   ;;  %v87_v9 = vlaneseq }
  0x1e   :  { %59 = vst.msk [vmem:[#allocation2] sm:$0xff] %vm58_vm0, %v365_v0  ;;  %267 = vmatprep.subr.bf16.mxu0 %v365_v0  ;;  %273 = vmatprep.subr.mxu1 %v365_v0  ;;  %v250_v2 = vld [vmem:[%s431_s2] ss:$0 sm:$0xff]  ;;  %v258_v3 = vunpack.c.l.bf16 %v257_v1  ;;  %v259_v4 = vunpack.c.h.bf16 %v257_v1  ;;  %v81_v10 = vstv %s432_s3  ;;  %vm99_vm3 = vcmask 130048   ;;  %v152_v22 = vld [vmem:[#allocation7 + $0x18] sm:$0xff]  ;;  %v150_v24 = vld [vmem:[#allocation7 + $0x8] sm:$0xff] }
  0x1f   :  { %269 = vmatprep.mubr.msk.bf16.mxu0 %vm366_vm1, %v365_v0  ;;  %281 = vmatprep.mubr.msk.f32.mxu1 %vm366_vm1, %v365_v0  ;;  %v88_v12 = vshrl.u32 %v87_v9, 7  ;;  %v251_v13 = vld [vmem:[%s430_s1] ss:$0 sm:$0xff]  ;;  %v149_v25 = vld [vmem:[#allocation7] sm:$0xff]  ;;  %s367_s14 = smov [#allocation9]  }
  0x20   :  { %v71_v5 = vmul.f32 %v258_v3, %v250_v2  ;;  %v72_v6 = vmul.f32 %v259_v4, %v250_v2  ;;  %274 = vmatpush3.msra.mxu1 %v152_v22  ;;  %v151_v23 = vld [vmem:[#allocation7 + $0x10] sm:$0xff]  ;;  %s240_s15 = sshll.u32 %s367_s14, 4  ;;  %s241_s15 = int_to_ptr.vmem [resolvable:$true] %s240_s15 }
  0x21   :  { %vm94_vm2 = vcmp.eq.s32.totalorder %v88_v12, %v251_v13  ;;  %275 = vmatprep.subr.mxu1 %v365_v0  ;;  %v254_v33 = vld [vmem:[%s434_s5] ss:$0 sm:$0xff]  ;;  %s333_s16 = scalar_lea.vmem %s241_s15, 128  ;;  %p338_p11 = scmp.lt.s32.totalorder %s241_s15, %s241_s15 }
  0x22   :  { %v74_v7 = vsel %vm58_vm0, %v71_v5, 0.0  ;;  %v77_v8 = vsel %vm58_vm0, %v72_v6, 0.0  ;;  %v252_v19 = vsel %vm94_vm2, 1.0, %v365_v0  ;;  %276 = vmatpush3.msra.mxu1 %v151_v23  ;;  %p334_p10 = scmp.ne.s32.totalorder %s241_s15, %s333_s16  ;;  %p339_p12 = scmp.lt.s32.totalorder %s333_s16, %s333_s16 }
  0x23   :  { %75 = vadd.xlane.f32.xlu0 %v74_v7  ;;  %v97_v21 = vpack.c.bf16 %v252_v19, %v252_v19  ;;  %277 = vmatprep.subr.mxu1 %v365_v0 }
  0x24   :  { %278 = vmatpush3.msra.mxu1 %v150_v24  ;;  %p340_p13 = por %p339_p12, %p338_p11 }
  0x25   :  { %279 = vmatprep.subr.mxu1 %v365_v0  ;;  %v98_v26 = vld [vmem:[#allocation2] sm:$0xff] }
  0x26   :  { %280 = vmatpush3.msra.mxu1 %v149_v25  ;;  %p341_p0 = pnand %p340_p13, %p334_p10 }
  0x27   :  { %78 = vadd.xlane.f32.xlu0 %v77_v8 }
  0xac   :  { %v76_v11 = vpop.xlane.xlu0 %75 }
  0xad   :  { %v82_v14 = vadd.f32 %v81_v10, %v76_v11 }
  0xaf   :  { %v84_v17 = vmul.f32 %v258_v3, %v82_v14 }
  0xb0   :  { %v79_v15 = vpop.xlane.xlu0 %78 }
  0xb1   :  { %v83_v16 = vadd.f32 %v81_v10, %v79_v15 }
  0xb3   :  { %v85_v18 = vmul.f32 %v259_v4, %v83_v16 }
  0xb5   :  { %v86_v20 = vpack.c.bf16 %v85_v18, %v84_v17 }
  0xb7   :  { %268 = vmatpush3.bf16.msra.mxu0 %v86_v20 }
  0xba   :  { %270 = vmatmul.mubr.msk.bf16.vlgmr.msra.gmra.mxu0 %vm99_vm3, %v97_v21 }
 0x17a   :  { %v137_v27 = vpop.f32.mrf.mxu0 }
 0x17b   :  { %v143_v28 = vadd.f32 %v137_v27, %v98_v26 }
 0x17c   :  { %v271_v29 = vpop.f32.mrf.mxu0 }
 0x17d   :  { %144 = vst.msk [vmem:[#allocation2] sm:$0xff] %vm58_vm0, %v143_v28 }
 0x17e   :  { %v140_v30 = vpop.f32.mrf.mxu0 }
 0x180   :  { %v272_v31 = vpop.f32.mrf.mxu0 }
 0x184   :  { %v148_v32 = vld [vmem:[#allocation2] sm:$0xff] }
 0x185   :  { %282 = vmatmul.mubr.msk.f32.vlgmr.msra.gmra.mxu1 %vm58_vm0, %v148_v32 }
 0x245   :  { %v229_v34 = vpop.f32.mrf.mxu1 }
 0x246   :  { %v230_v35 = vadd.f32 %v254_v33, %v229_v34 }
 0x247   :  { %v283_v36 = vpop.f32.mrf.mxu1 }
 0x248   :  { %233 = vst [vmem:[#allocation9] sm:$0xff] %v230_v35 }
 0x249   :  { %344 = shalt.err (!%p341_p0)
}
 0x24a   :  { %243 = dma.vmem_to_hbm [thread:$0]  %s241_s15, 128, %s435_s6, [#allocation6]  }
 0x24b   :  { %357 = dma.done.wait [#allocation6], 128  }
 0x24c   :  { %358 = vsyncadd [#allocation6], 4294967168 }
 0x24d   :  { %247 = vsyncpa [#allocation5], 1 }
 0x24e   :  { %248 = vsyncpa [#allocation8], 1 }
 0x24f   :  { %249 = vsyncpa [#allocation6], 1 }

</bundles_post_ra>
